<compile_context>
chip_gen: v7x
topology: tpu7x:2x2x1
jax: 0.10.0
libtpu: 0.0.40
codegen_flags: <defaults>
</compile_context>

<pallas_src>
import jax
import jax.numpy as jnp
from jax import lax
from jax.experimental import pallas as pl
from jax.experimental.pallas import tpu as pltpu


def _gp_kernel(eps_ref, real_ref, fake_ref, w1t_ref, gram_ref, w2_ref,
               pen_ref, h_acc):
    k = pl.program_id(1)

    @pl.when(k == 0)
    def _init():
        h_acc[...] = jnp.zeros_like(h_acc)

    # Interpolation in the streamed dtype (bf16 stays bf16 on the VPU/MXU).
    real = real_ref[...]                                        # (TB, TDin)
    fake = fake_ref[...]                                        # (TB, TDin)
    eps = eps_ref[...].astype(real.dtype)                       # (TB, 1)
    x = eps * real + (1.0 - eps) * fake                         # (TB, TDin)

    w1t = w1t_ref[...]                                          # (H, TDin) lane-dense
    if x.dtype != w1t.dtype:                                    # static at trace time
        x = x.astype(w1t.dtype)
    # h += x @ W1  (contract over TDin on the MXU, f32 accumulation)
    h_acc[...] += lax.dot_general(
        x, w1t,
        dimension_numbers=(((1,), (1,)), ((), ())),
        preferred_element_type=jnp.float32)                     # (TB, H)

    @pl.when(k == pl.num_programs(1) - 1)
    def _finalize():
        h = h_acc[...]                                          # (TB, H) f32
        w2_row = w2_ref[...].astype(jnp.float32)                # (1, H)
        # dD/dh with grad_outputs = ones:  leaky_relu'(h) * W2^T
        dh = jnp.where(h > 0, 1.0, 0.2) * w2_row                # (TB, H)
        # per-sample ||dh @ W1^T||^2 == rowsum((dh @ (W1^T W1)) * dh)
        ss = jnp.sum(jnp.dot(dh, gram_ref[...],
                             preferred_element_type=jnp.float32) * dh,
                     axis=1, keepdims=True)                     # (TB, 1)
        ss = jnp.maximum(ss, 0.0)                               # guard tiny negatives
        nrm = jnp.sqrt(ss)
        pen_ref[...] = (nrm - 1.0) ** 2


def _round_up(n, m):
    return ((n + m - 1) // m) * m


def _sublane_pack(dtype):
    """Sublane packing for a dtype: 8 for f32, 16 for bf16, 32 for int8/fp8."""
    return max(8, 32 // jnp.dtype(dtype).itemsize)


def _pick_tile(n, target, align):
    """Largest tile t with n % t == 0, t <= target, t % align == 0 (or t == n)."""
    if n <= target:
        return n
    t = (target // align) * align
    while t >= align:
        if n % t == 0:
            return t
        t -= align
    return n  # n is pre-padded to a multiple of `align`, so this is rare


def gradient_penalty(eps, real, fake, w1, w2, *, batch_tile_target=256,
                     din_tile_target=4096):
    """eps: (B,1,1,1) or (B,1); real/fake: (B,C,H,W); w1: (Din,H); w2: (H,1)."""
    B = real.shape[0]
    din = 1
    for s in real.shape[1:]:
        din *= s
    hidden = w1.shape[1]

    # Flatten like torch's .view(B, -1); keep native dtypes (no upcast).
    real_f = real.reshape(B, din)
    fake_f = fake.reshape(B, din)
    eps_f = eps.reshape(B, 1).astype(jnp.float32)
    w2_row = w2.reshape(1, hidden)

    # Tiny (H, H) Gram matrix of the first layer, precomputed once in f32.
    w1_f32 = w1.astype(jnp.float32)
    gram = jnp.dot(w1_f32.T, w1_f32)

    # Pre-transpose W1 -> (H, Din) so the streamed W1 tiles are lane-dense.
    w1t = jnp.transpose(w1)

    # --- pad Din to a multiple of 128 (zero-padded W1 rows contribute 0) ---
    din_pad = _round_up(din, 128)
    if din_pad != din:
        p = din_pad - din
        real_f = jnp.pad(real_f, ((0, 0), (0, p)))
        fake_f = jnp.pad(fake_f, ((0, 0), (0, p)))
        w1t = jnp.pad(w1t, ((0, 0), (0, p)))

    # --- pad batch to the sublane pack of the streamed dtype ---
    sub = _sublane_pack(real_f.dtype)
    b_pad = _round_up(B, sub) if B > sub else B
    if b_pad != B:
        p = b_pad - B
        real_f = jnp.pad(real_f, ((0, p), (0, 0)))
        fake_f = jnp.pad(fake_f, ((0, p), (0, 0)))
        eps_f = jnp.pad(eps_f, ((0, p), (0, 0)))

    # --- tile selection ---
    # Give the 'parallel' batch axis >= 2 grid steps when possible so v7x's
    # two TensorCores both get work.
    if b_pad >= 2 * sub:
        tb = _pick_tile(b_pad, min(batch_tile_target, b_pad // 2), sub)
    else:
        tb = b_pad
    tdin = _pick_tile(din_pad, din_tile_target, 128)
    grid = (b_pad // tb, din_pad // tdin)

    # --- VMEM budget: double-buffered streamed tiles + in-kernel temporaries,
    #     clamped to the actual chip's VMEM (8 MiB headroom) ---
    in_item = jnp.dtype(real_f.dtype).itemsize
    w1_item = jnp.dtype(w1t.dtype).itemsize
    compute_item = max(in_item, w1_item)
    stream_bytes = 2 * (2 * tb * tdin * in_item        # real + fake tiles
                        + hidden * tdin * w1_item)     # lane-dense W1^T tile
    temp_bytes = (2 * tb * tdin * compute_item         # x + one interp temp
                  + tb * hidden * 4                    # h_acc scratch
                  + hidden * 128 * 4                   # gram (lane-padded)
                  + 2 * tb * 128 * 4)                  # eps / output blocks
    vmem_need = stream_bytes + temp_bytes + (4 << 20)
    try:
        vmem_cap = pltpu.get_tpu_info().vmem_capacity_bytes
    except Exception:
        vmem_cap = 64 << 20                            # conservative (v7x per-TC)
    vmem_limit = int(min(max(vmem_need, 16 << 20), vmem_cap - (8 << 20)))

    per_sample = pl.pallas_call(
        _gp_kernel,
        out_shape=jax.ShapeDtypeStruct((b_pad, 1), jnp.float32),
        grid_spec=pltpu.PrefetchScalarGridSpec(
            num_scalar_prefetch=0,
            grid=grid,
            in_specs=[
                pl.BlockSpec((tb, 1), lambda i, k: (i, 0)),            # eps
                pl.BlockSpec((tb, tdin), lambda i, k: (i, k)),         # real
                pl.BlockSpec((tb, tdin), lambda i, k: (i, k)),         # fake
                pl.BlockSpec((hidden, tdin), lambda i, k: (0, k)),     # W1^T tile
                pl.BlockSpec((hidden, hidden), lambda i, k: (0, 0)),   # W1^T W1
                pl.BlockSpec((1, hidden), lambda i, k: (0, 0)),        # W2 row
            ],
            out_specs=pl.BlockSpec((tb, 1), lambda i, k: (i, 0)),
            scratch_shapes=[pltpu.VMEM((tb, hidden), jnp.float32)],
        ),
        compiler_params=pltpu.CompilerParams(
            dimension_semantics=("parallel", "arbitrary"),
            vmem_limit_bytes=vmem_limit,
        ),
    )(eps_f, real_f, fake_f, w1t, gram, w2_row)

    # gradient_penalty = mean over the real batch (drop padded rows); cheap glue.
    return jnp.mean(per_sample[:B, 0])


# ---------------- pure-JAX reference (autodiff, like torch.autograd.grad) ----
def _d_apply(x_flat, w1, w2):
    h = x_flat @ w1
    a = jnp.where(h > 0, h, 0.2 * h)
    return a @ w2


def _ref_gradient_penalty(eps, real, fake, w1, w2):
    B = real.shape[0]
    rf = real.reshape(B, -1).astype(jnp.float32)
    ff = fake.reshape(B, -1).astype(jnp.float32)
    e = eps.reshape(B, 1).astype(jnp.float32)
    x = e * rf + (1.0 - e) * ff
    grads = jax.grad(lambda xx: jnp.sum(
        _d_apply(xx, w1.astype(jnp.float32), w2.astype(jnp.float32))))(x)
    nrm = jnp.linalg.norm(grads.reshape(B, -1), axis=1)
    return jnp.mean((nrm - 1.0) ** 2)


if __name__ == "__main__":
    key = jax.random.PRNGKey(0)
    k_real, k_fake, k_eps, k_w1, k_w2 = jax.random.split(key, 5)

    B, C, H, W = 2, 4, 16, 16
    hidden = 32
    Din = C * H * W

    real = jax.random.normal(k_real, (B, C, H, W), dtype=jnp.float32)
    fake = jax.random.normal(k_fake, (B, C, H, W), dtype=jnp.float32)
    # eps ~ U(0,1) per sample, shape (B,1,1,1) like the PyTorch module
    eps = jax.random.uniform(k_eps, (B, 1, 1, 1), dtype=jnp.float32)

    # Deterministic synthetic discriminator weights
    w1 = 0.02 * jax.random.normal(k_w1, (Din, hidden), dtype=jnp.float32)
    w2 = 0.02 * jax.random.normal(k_w2, (hidden, 1), dtype=jnp.float32)

    # din_tile_target=512 -> 2 Din steps at this toy size (exercises the
    # accumulator init/finalize path); the default (4096) is the bandwidth pick.
    out = gradient_penalty(eps, real, fake, w1, w2, din_tile_target=512)
    out = jax.block_until_ready(out)
    ref = _ref_gradient_penalty(eps, real, fake, w1, w2)
    assert jnp.allclose(out, ref, rtol=1e-5, atol=1e-5), (out, ref)

    # Second tiny case with Din not a multiple of 128 (exercises wrapper padding).
    real2 = jax.random.normal(k_fake, (2, 3, 5, 5), dtype=jnp.float32)
    fake2 = jax.random.normal(k_real, (2, 3, 5, 5), dtype=jnp.float32)
    eps2 = jax.random.uniform(k_eps, (2, 1, 1, 1), dtype=jnp.float32)
    w1b = 0.02 * jax.random.normal(k_w1, (75, hidden), dtype=jnp.float32)
    out2 = gradient_penalty(eps2, real2, fake2, w1b, w2)
    out2 = jax.block_until_ready(out2)
    ref2 = _ref_gradient_penalty(eps2, real2, fake2, w1b, w2)
    assert jnp.allclose(out2, ref2, rtol=1e-5, atol=1e-5), (out2, ref2)

    print("KERNEL_OK")
</pallas_src>

<mosaic_0001>
module attributes {stable_mosaic.version = 11 : i64} {
  func.func @_gp_kernel(%arg0: i32, %arg1: i32, %arg2: memref<2x1xf32, #tpu.memory_space<vmem>>, %arg3: memref<2x512xf32, #tpu.memory_space<vmem>>, %arg4: memref<2x512xf32, #tpu.memory_space<vmem>>, %arg5: memref<32x512xf32, #tpu.memory_space<vmem>>, %arg6: memref<32x32xf32, #tpu.memory_space<vmem>>, %arg7: memref<1x32xf32, #tpu.memory_space<vmem>>, %arg8: memref<2x1xf32, #tpu.memory_space<vmem>>, %arg9: memref<2x32xf32, #tpu.memory_space<vmem>>) attributes {dimension_semantics = [#tpu.dimension_semantics<parallel>, #tpu.dimension_semantics<arbitrary>], iteration_bounds = array<i64: 1, 2>, scalar_prefetch = 0 : i64, scratch_operands = 1 : i64, tpu.core_type = #tpu.core_type<tc>, window_params = [{transform_indices = @transform_0, window_bounds = array<i64: 2, 1>}, {transform_indices = @transform_1, window_bounds = array<i64: 2, 512>}, {transform_indices = @transform_2, window_bounds = array<i64: 2, 512>}, {transform_indices = @transform_3, window_bounds = array<i64: 32, 512>}, {pipeline_mode = #tpu.pipeline_mode<synchronous>, transform_indices = @transform_4, window_bounds = array<i64: 32, 32>}, {pipeline_mode = #tpu.pipeline_mode<synchronous>, transform_indices = @transform_5, window_bounds = array<i64: 1, 32>}, {transform_indices = @transform_6, window_bounds = array<i64: 2, 1>}]} {
    %c0_i32 = arith.constant 0 : i32
    %0 = arith.cmpi eq, %arg1, %c0_i32 : i32
    %1 = arith.extui %0 : i1 to i32
    %c0_i32_0 = arith.constant 0 : i32
    %2 = arith.cmpi ne, %1, %c0_i32_0 : i32
    scf.if %2 {
      %cst_14 = arith.constant 0.000000e+00 : f32
      %21 = vector.broadcast %cst_14 : f32 to vector<2x32xf32>
      %c0_15 = arith.constant 0 : index
      %c0_16 = arith.constant 0 : index
      %22 = vector.load %arg9[%c0_15, %c0_16] : memref<2x32xf32, #tpu.memory_space<vmem>>, vector<2x32xf32>
      tpu.vector_store %arg9[%c0_15, %c0_16], %21 {strides = array<i32>} : memref<2x32xf32, #tpu.memory_space<vmem>>, vector<2x32xf32>,
    } else {
    }
    %c0 = arith.constant 0 : index
    %c0_1 = arith.constant 0 : index
    %3 = vector.load %arg3[%c0, %c0_1] : memref<2x512xf32, #tpu.memory_space<vmem>>, vector<2x512xf32>
    %c0_2 = arith.constant 0 : index
    %c0_3 = arith.constant 0 : index
    %4 = vector.load %arg4[%c0_2, %c0_3] : memref<2x512xf32, #tpu.memory_space<vmem>>, vector<2x512xf32>
    %c0_4 = arith.constant 0 : index
    %c0_5 = arith.constant 0 : index
    %5 = vector.load %arg2[%c0_4, %c0_5] : memref<2x1xf32, #tpu.memory_space<vmem>>, vector<2x1xf32>
    %6 = vector.broadcast %5 : vector<2x1xf32> to vector<2x512xf32>
    %7 = arith.mulf %6, %3 : vector<2x512xf32>
    %cst = arith.constant 1.000000e+00 : f32
    %8 = vector.broadcast %cst : f32 to vector<2x1xf32>
    %9 = arith.subf %8, %5 : vector<2x1xf32>
    %10 = vector.broadcast %9 : vector<2x1xf32> to vector<2x512xf32>
    %11 = arith.mulf %10, %4 : vector<2x512xf32>
    %12 = arith.addf %7, %11 : vector<2x512xf32>
    %c0_6 = arith.constant 0 : index
    %c0_7 = arith.constant 0 : index
    %13 = vector.load %arg5[%c0_6, %c0_7] : memref<32x512xf32, #tpu.memory_space<vmem>>, vector<32x512xf32>
    %c0_8 = arith.constant 0 : index
    %c0_9 = arith.constant 0 : index
    %14 = vector.load %arg9[%c0_8, %c0_9] : memref<2x32xf32, #tpu.memory_space<vmem>>, vector<2x32xf32>
    %cst_10 = arith.constant dense<0.000000e+00> : vector<2x32xf32>
    %15 = tpu.matmul %12, %13, %cst_10 {dimension_numbers = #tpu.dot_dimension_numbers<[1], [1], [0], [0], [0, 0, 1, 0], [], []>} : vector<2x512xf32>, vector<32x512xf32>, vector<2x32xf32> -> vector<2x32xf32>
    %16 = arith.addf %14, %15 : vector<2x32xf32>
    %c0_11 = arith.constant 0 : index
    %c0_12 = arith.constant 0 : index
    %17 = vector.load %arg9[%c0_11, %c0_12] : memref<2x32xf32, #tpu.memory_space<vmem>>, vector<2x32xf32>
    tpu.vector_store %arg9[%c0_11, %c0_12], %16 {strides = array<i32>} : memref<2x32xf32, #tpu.memory_space<vmem>>, vector<2x32xf32>,
    %c1_i32 = arith.constant 1 : i32
    %18 = arith.cmpi eq, %arg1, %c1_i32 : i32
    %19 = arith.extui %18 : i1 to i32
    %c0_i32_13 = arith.constant 0 : i32
    %20 = arith.cmpi ne, %19, %c0_i32_13 : i32
    scf.if %20 {
      %c0_14 = arith.constant 0 : index
      %c0_15 = arith.constant 0 : index
      %21 = vector.load %arg9[%c0_14, %c0_15] : memref<2x32xf32, #tpu.memory_space<vmem>>, vector<2x32xf32>
      %c0_16 = arith.constant 0 : index
      %c0_17 = arith.constant 0 : index
      %22 = vector.load %arg7[%c0_16, %c0_17] : memref<1x32xf32, #tpu.memory_space<vmem>>, vector<1x32xf32>
      %cst_18 = arith.constant 0.000000e+00 : f32
      %23 = vector.broadcast %cst_18 : f32 to vector<2x32xf32>
      %24 = arith.cmpf ogt, %21, %23 : vector<2x32xf32>
      %cst_19 = arith.constant 1.000000e+00 : f32
      %cst_20 = arith.constant 2.000000e-01 : f32
      %25 = vector.broadcast %cst_19 : f32 to vector<2x32xf32>
      %26 = vector.broadcast %cst_20 : f32 to vector<2x32xf32>
      %27 = arith.select %24, %25, %26 : vector<2x32xi1>, vector<2x32xf32>
      %28 = vector.broadcast %22 : vector<1x32xf32> to vector<2x32xf32>
      %29 = arith.mulf %27, %28 : vector<2x32xf32>
      %c0_21 = arith.constant 0 : index
      %c0_22 = arith.constant 0 : index
      %30 = vector.load %arg6[%c0_21, %c0_22] : memref<32x32xf32, #tpu.memory_space<vmem>>, vector<32x32xf32>
      %cst_23 = arith.constant dense<0.000000e+00> : vector<2x32xf32>
      %31 = tpu.matmul %29, %30, %cst_23 {dimension_numbers = #tpu.dot_dimension_numbers<[1], [0], [0], [1], [0, 0, 1, 1], [], []>} : vector<2x32xf32>, vector<32x32xf32>, vector<2x32xf32> -> vector<2x32xf32>
      %32 = arith.mulf %31, %29 : vector<2x32xf32>
      %cst_24 = arith.constant dense<0.000000e+00> : vector<2xf32>
      %33 = vector.multi_reduction <add>, %32, %cst_24 [1] : vector<2x32xf32> to vector<2xf32>
      %34 = vector.shape_cast %33 : vector<2xf32> to vector<2x1xf32>
      %cst_25 = arith.constant 0.000000e+00 : f32
      %35 = vector.broadcast %cst_25 : f32 to vector<2x1xf32>
      %36 = arith.maximumf %34, %35 : vector<2x1xf32>
      %37 = math.sqrt %36 : vector<2x1xf32>
      %cst_26 = arith.constant 1.000000e+00 : f32
      %38 = vector.broadcast %cst_26 : f32 to vector<2x1xf32>
      %39 = arith.subf %37, %38 : vector<2x1xf32>
      %40 = arith.mulf %39, %39 : vector<2x1xf32>
      %c0_27 = arith.constant 0 : index
      %c0_28 = arith.constant 0 : index
      %41 = vector.load %arg8[%c0_27, %c0_28] : memref<2x1xf32, #tpu.memory_space<vmem>>, vector<2x1xf32>
      tpu.vector_store %arg8[%c0_27, %c0_28], %40 {strides = array<i32>} : memref<2x1xf32, #tpu.memory_space<vmem>>, vector<2x1xf32>,
    } else {
    }
    return
  }
  func.func @transform_0(%arg0: i32, %arg1: i32) -> (i32, i32) {
    %c0_i32 = arith.constant 0 : i32
    %c0_i32_0 = arith.constant 0 : i32
    return %arg0, %c0_i32 : i32, i32
  }
  func.func @transform_1(%arg0: i32, %arg1: i32) -> (i32, i32) {
    %c0_i32 = arith.constant 0 : i32
    return %arg0, %arg1 : i32, i32
  }
  func.func @transform_2(%arg0: i32, %arg1: i32) -> (i32, i32) {
    %c0_i32 = arith.constant 0 : i32
    return %arg0, %arg1 : i32, i32
  }
  func.func @transform_3(%arg0: i32, %arg1: i32) -> (i32, i32) {
    %c0_i32 = arith.constant 0 : i32
    %c0_i32_0 = arith.constant 0 : i32
    return %c0_i32, %arg1 : i32, i32
  }
  func.func @transform_4(%arg0: i32, %arg1: i32) -> (i32, i32) {
    %c0_i32 = arith.constant 0 : i32
    %c0_i32_0 = arith.constant 0 : i32
    %c0_i32_1 = arith.constant 0 : i32
    return %c0_i32, %c0_i32_0 : i32, i32
  }
  func.func @transform_5(%arg0: i32, %arg1: i32) -> (i32, i32) {
    %c0_i32 = arith.constant 0 : i32
    %c0_i32_0 = arith.constant 0 : i32
    %c0_i32_1 = arith.constant 0 : i32
    return %c0_i32, %c0_i32_0 : i32, i32
  }
  func.func @transform_6(%arg0: i32, %arg1: i32) -> (i32, i32) {
    %c0_i32 = arith.constant 0 : i32
    %c0_i32_0 = arith.constant 0 : i32
    return %arg0, %c0_i32 : i32, i32
  }
}

</mosaic_0001>

<bundles_post_ra>
// kernel: tpu_custom_call.1
= control target key start
LH: loop header
LB: loop body
LE: loop exit
PB: predicated region body
PF: predicated region fallthrough
CT: control target
= control target key end

     0   :  { %s1554_s0 = inlined_call_operand.vmem [shape: f32[2,1], index: 0, kind: input, shape index: {}]   ;;  %s1555_s1 = inlined_call_operand.hbm [shape: f32[2,1024], index: 1, kind: input, shape index: {}]   ;;  %s1556_s2 = inlined_call_operand.hbm [shape: f32[2,1024], index: 2, kind: input, shape index: {}]   ;;  %s1557_s3 = inlined_call_operand.hbm [shape: f32[32,1024], index: 3, kind: input, shape index: {}]   ;;  %s1558_s4 = inlined_call_operand.hbm [shape: f32[32,32], index: 4, kind: input, shape index: {}]   ;;  %s1559_s5 = inlined_call_operand.vmem [shape: f32[1,32], index: 5, kind: input, shape index: {}]   ;;  %s1560_s6 = inlined_call_operand.vmem [shape: f32[2,1], index: 6, kind: output, shape index: {}]  }
   0x1   :  { %1574 = sst [smem:[#allocation17_spill]] %s1556_s2 }
   0x2   :  { %1575 = sst [smem:[#allocation18_spill]] %s1559_s5 }
   0x3   :  { %1576 = sst [smem:[#allocation19_spill]] %s1560_s6 }
   0x4   :  { %11 = vsyncpa [#allocation4], 0 }
   0x5   :  { %13 = vsyncpa [#allocation4 + $0x1], 0 }
   0x6   :  { %14 = vsyncpa [#allocation6], 0 }
   0x7   :  { %16 = vsyncpa [#allocation6 + $0x1], 0 }
   0x8   :  { %17 = vsyncpa [#allocation9], 0  ;;  %s1277_s21 = smov 0   ;;  %s1279_s22 = smov 0  }
   0x9   :  { %s1281_s23 = smov 0   ;;  %s1283_s24 = smov 0  }
   0xa   :  { %s1285_s25 = smov 0   ;;  %s1287_s26 = smov 0  }
   0xb LB: > { %1577 = sst [smem:[#allocation13_spill]] %s1212_s23  ;;  %s32_s27 = sadd.s32 1, %s1220_s25  ;;  %s1224_s26 = sphi %s1287_s26, %s23_s26   ;;  %s1220_s25 = sphi %s1285_s25, %s1600_s25   ;;  %s1216_s24 = sphi %s1283_s24, %s1599_s24   ;;  %s1212_s23 = sphi %s1281_s23, %s1598_s23   ;;  %s1208_s22 = sphi %s1279_s22, %s1602_s22   ;;  %s1204_s21 = sphi %s1277_s21, %s1601_s21  }
   0xc   : > { %1578 = sst [smem:[#allocation14_spill]] %s1220_s25  ;;  %s70_s28 = sadd.s32 1, %s1212_s23 }
   0xd   : > { %p33_p0 = scmp.ge.s32.totalorder %s32_s27, 2  ;;  %p77_p1 = scmp.ne.s32.totalorder %s1212_s23, %s1208_s22 }
   0xe   : > { %p78_p2 = scmp.eq.s32.totalorder %s1224_s26, 0  ;;  %p980_p4 = scmp.lt.s32.totalorder %s1224_s26, 2 }
   0xf   : > { %s1604_s27 = smov (%p33_p0, %s32_s27), 0  ;;  %s1318_s30 = sand.u32 1, %s1212_s23  }
  0x10   : > { %1579 = sst [smem:[#allocation15_spill]] %s1604_s27  ;;  %p79_p3 = por %p78_p2, %p77_p1 }
  0x11   : > { %s66_s29 = ssub.s32 %s1220_s25, %s1604_s27  ;;  %s1561_s7 = sshll.u32 %s1318_s30, 3 }
  0x12   : > { %p68_p5 = scmp.eq.s32.totalorder %s66_s29, 0  ;;  %s914_s8 = sshll.u32 %s1220_s25, 7 }
  0x13   : > { %p1322_p6 = pnand %p980_p4, %p79_p3  ;;  %s273_s11 = sand.u32 1, %s1224_s26  }
  0x14   : > { %s1327_s10 = scalar_select %p68_p5, %s1212_s23, %s70_s28  }
  0x15   : > { %s1580_s9 = scalar_select %p1322_p6, 1, 0 }
  0x16   : > { %1581 = sst [smem:[#allocation16_spill]] %s1327_s10  ;;  %s1582_s2 = sld [smem:[#allocation17_spill]] }
  0x17   : > { %s277_s15 = scalar_lea.vmem [#allocation5], %s1561_s7  ;;  %s898_s17 = sshll.u32 %s1318_s30, 7 }
  0x18   : > { %s287_s16 = sshll.u32 %s277_s15, 4  ;;  %s1342_s18 = scalar_lea.sflag [#allocation6], %s273_s11  ;;  %s1339_s16 = int_to_ptr.vmem [resolvable:$true] %s287_s16 }
  0x19   : > { %p1348_p8 = pneg %p1322_p6 }
  0x1b   : > { %s1583_s20 = scalar_select %p1348_p8, 1, 0 }
  0x1c   : > { %s1335_s14 = scalar_lea.hbm %s1582_s2, %s914_s8  ;;  %s1053_s12 = scalar_lea.hbm %s1582_s2, 256 }
  0x1d   : > { %s1048_s19 = scalar_lea.hbm %s1335_s14, 128  ;;  %p1054_p11 = scmp.lt.u32.totalorder %s1335_s14, %s1582_s2 }
  0x1e   : > { %p1049_p7 = scmp.ne.s32.totalorder %s1335_s14, %s1048_s19  ;;  %p1055_p12 = scmp.lt.u32.totalorder %s1053_s12, %s1048_s19 }
  0x1f   : > { %p1057_p0 = scmp.lt.u32.totalorder %s1048_s19, %s1335_s14 }
  0x20   : > { %p1051_p9 = pnand %p1348_p8, %p1049_p7  ;;  %p1056_p13 = por %p1055_p12, %p1054_p11 }
  0x22   : > { %p1052_p10 = pneg %p1051_p9  ;;  %p1058_p1 = por %p1057_p0, %p1056_p13 }
  0x24   : > { %p1059_p2 = pnand %p1058_p1, %p1052_p10 }
  0x26   : > { %1062 = shalt.err (!%p1059_p2)
}
  0x27   : > { %s1063_s11 = scalar_lea.vmem %s1339_s16, 128  ;;  %s1226_s28 = smov [#allocation5]  }
  0x28   : > { %p1064_p3 = scmp.ne.s32.totalorder %s1339_s16, %s1063_s11  ;;  %s1068_s29 = sshll.u32 %s1226_s28, 4  ;;  %s1069_s29 = int_to_ptr.vmem [resolvable:$false] %s1068_s29 }
  0x29   : > { %s1070_s13 = scalar_lea.vmem %s1069_s29, 256  ;;  %p1071_p7 = scmp.lt.s32.totalorder %s1339_s16, %s1069_s29 }
  0x2a   : > { %p1066_p4 = pnand %p1064_p3, %p1348_p8  ;;  %p1072_p9 = scmp.lt.s32.totalorder %s1070_s13, %s1063_s11 }
  0x2c   : > { %p1067_p5 = pneg %p1066_p4  ;;  %p1073_p11 = por %p1072_p9, %p1071_p7 }
  0x2e   : > { %p1074_p12 = pnand %p1073_p11, %p1067_p5 }
  0x30   : > { %1077 = shalt.err (!%p1074_p12)
}
  0x31   : > { %975 = dma.hbm_to_vmem [thread:$0]  (!%p1322_p6), %s1335_s14, 128, %s1339_s16, %s1342_s18  }
  0x32   : > { %s916_s19 = sshll.u32 %s1220_s25, 9  ;;  %s298_s28 = scalar_lea.vmem [#allocation7], %s898_s17 }
  0x33   : > { %s1376_s11 = scalar_lea.hbm %s1557_s3, %s916_s19  ;;  %s305_s29 = sshll.u32 %s298_s28, 4  ;;  %s1380_s29 = int_to_ptr.vmem [resolvable:$true] %s305_s29 }
  0x34   : > { %s1562_s13 = sadd.s32 4294967295, %s1224_s26   ;;  %p83_p10 = scmp.ne.s32.totalorder %s1208_s22, %s1204_s21 }
  0x35   : > { %p1387_p13 = scmp.eq.s32.totalorder %s1562_s13, 0  ;;  %p888_p0 = scmp.ge.s32.totalorder %s1224_s26, 1 }
  0x36   : > { %p216_p1 = scmp.lt.s32.totalorder %s1224_s26, 3  ;;  %s1227_s21 = smov [#allocation8]  }
  0x37   : > { %s1584_s7 = scalar_select %p1387_p13, 1, 0 }
  0x38   : > { %p1395_p2 = por %p1387_p13, %p83_p10  ;;  %p1399_p3 = pnand %p888_p0, %p216_p1 }
  0x39   : > { %s235_s17 = sshll.u32 %s1227_s21, 4  ;;  %s1416_s28 = scalar_lea.hbm %s1555_s1, %s914_s8  ;;  %s236_s17 = int_to_ptr.vmem [resolvable:$true] %s235_s17 }
  0x3a   : > { %s1585_s14 = scalar_select %p1395_p2, 1, 0 }
  0x3b   : > { %s1586_s16 = scalar_select %p1399_p3, 1, 0 }
  0x3c   : > { %p965_p4 = pneg %p1399_p3  ;;  %s1588_s13 = sshll.u32 %s1318_s30, 3 }
  0x3d   : > { %s256_s2 = scalar_lea.vmem [#allocation3], %s1588_s13  ;;  %s1078_s23 = scalar_lea.hbm %s1558_s4, 512 }
  0x3e   : > { %p1407_p5 = pnand %p965_p4, %p1387_p13  ;;  %s266_s27 = sshll.u32 %s256_s2, 4  ;;  %s1420_s27 = int_to_ptr.vmem [resolvable:$true] %s266_s27 }
  0x3f   : > { %p1079_p7 = scmp.ne.s32.totalorder %s1558_s4, %s1078_s23  ;;  %p1085_p10 = scmp.lt.u32.totalorder %s1078_s23, %s1558_s4 }
  0x40   : > { %p1080_p9 = pneg %p1407_p5 }
  0x42   : > { %p1081_p11 = pnand %p1080_p9, %p1079_p7 }
  0x44   : > { %p1082_p12 = pneg %p1081_p11 }
  0x46   : > { %p1087_p0 = pnand %p1085_p10, %p1082_p12 }
  0x48   : > { %1090 = shalt.err (!%p1087_p0)
}
  0x49   : > { %s1091_s2 = scalar_lea.vmem %s236_s17, 512  ;;  %p1099_p2 = scmp.lt.s32.totalorder %s236_s17, %s236_s17 }
  0x4a   : > { %p1092_p1 = scmp.ne.s32.totalorder %s236_s17, %s1091_s2  ;;  %p1100_p3 = scmp.lt.s32.totalorder %s1091_s2, %s1091_s2 }
  0x4c   : > { %p1094_p4 = pnand %p1092_p1, %p1080_p9  ;;  %p1101_p6 = por %p1100_p3, %p1099_p2 }
  0x4e   : > { %p1095_p13 = pneg %p1094_p4 }
  0x50   : > { %p1102_p8 = pnand %p1101_p6, %p1095_p13 }
  0x52   : > { %1105 = shalt.err (!%p1102_p8)
}
  0x53   : > { %s1228_s5 = smov 128   ;;  %s1229_s6 = smov 8  }
  0x54   : > { %968 = dma.hbm_to_vmem [thread:$0]  (!%p1407_p5), %s1558_s4, 512, %s236_s17, [#allocation9], %s1228_s5, %s1228_s5, %s1229_s6  }
  0x55   : > { %s253_s13 = scalar_lea.sflag [#allocation4], %s1318_s30  ;;  %s1106_s15 = scalar_lea.hbm %s1416_s28, 128 }
  0x56   : > { %p1107_p7 = scmp.ne.s32.totalorder %s1416_s28, %s1106_s15  ;;  %p1589_p2 = scmp.ne.s32.totalorder %s1583_s20, 0 }
  0x57   : > { %s1111_s8 = scalar_lea.hbm %s1555_s1, 256  ;;  %p1112_p13 = scmp.lt.u32.totalorder %s1416_s28, %s1555_s1 }
  0x58   : > { %p1109_p6 = pnand %p1107_p7, %p1589_p2  ;;  %p1113_p3 = scmp.lt.u32.totalorder %s1111_s8, %s1106_s15 }
  0x59   : > { %p1115_p11 = scmp.lt.u32.totalorder %s1106_s15, %s1416_s28 }
  0x5a   : > { %p1110_p8 = pneg %p1109_p6  ;;  %p1114_p9 = por %p1113_p3, %p1112_p13 }
  0x5c   : > { %p1116_p12 = por %p1115_p11, %p1114_p9 }
  0x5e   : > { %p1117_p10 = pnand %p1116_p12, %p1110_p8 }
  0x60   : > { %1120 = shalt.err (!%p1117_p10)
}
  0x61   : > { %s1121_s30 = scalar_lea.vmem %s1420_s27, 128  ;;  %s1230_s17 = smov [#allocation3]  }
  0x62   : > { %p1122_p5 = scmp.ne.s32.totalorder %s1420_s27, %s1121_s30  ;;  %s1126_s19 = sshll.u32 %s1230_s17, 4  ;;  %s1127_s19 = int_to_ptr.vmem [resolvable:$false] %s1126_s19 }
  0x63   : > { %s1128_s25 = scalar_lea.vmem %s1127_s19, 256  ;;  %p1129_p4 = scmp.lt.s32.totalorder %s1420_s27, %s1127_s19 }
  0x64   : > { %p1124_p0 = pnand %p1122_p5, %p1589_p2  ;;  %p1130_p7 = scmp.lt.s32.totalorder %s1128_s25, %s1121_s30 }
  0x66   : > { %p1125_p1 = pneg %p1124_p0  ;;  %p1131_p6 = por %p1130_p7, %p1129_p4 }
  0x68   : > { %p1132_p13 = pnand %p1131_p6, %p1125_p1 }
  0x6a   : > { %1135 = shalt.err (!%p1132_p13)
}
  0x6b   : > { %p1590_p8 = scmp.ne.s32.totalorder %s1580_s9, 0  ;;  %s1136_s5 = scalar_lea.hbm %s1376_s11, 2048 }
  0x6c   : > { %p1137_p3 = scmp.ne.s32.totalorder %s1376_s11, %s1136_s5  ;;  %s1141_s10 = scalar_lea.hbm %s1557_s3, 4096 }
  0x6d   : > { %972 = dma.hbm_to_vmem [thread:$0]  (!%p1590_p8), %s1416_s28, 128, %s1420_s27, %s253_s13  }
  0x6e   : > { %p1139_p9 = pnand %p1137_p3, %p1589_p2  ;;  %p1142_p12 = scmp.lt.u32.totalorder %s1376_s11, %s1557_s3 }
  0x6f   : > { %p1143_p10 = scmp.lt.u32.totalorder %s1141_s10, %s1136_s5  ;;  %p1145_p0 = scmp.lt.u32.totalorder %s1136_s5, %s1376_s11 }
  0x70   : > { %p1140_p11 = pneg %p1139_p9 }
  0x71   : > { %p1144_p5 = por %p1143_p10, %p1142_p12 }
  0x73   : > { %p1146_p1 = por %p1145_p0, %p1144_p5 }
  0x75   : > { %p1147_p4 = pnand %p1146_p1, %p1140_p11 }
  0x77   : > { %1150 = shalt.err (!%p1147_p4)
}
  0x78   : > { %s1151_s27 = scalar_lea.vmem %s1380_s29, 2048  ;;  %s1231_s28 = smov [#allocation7]  }
  0x79   : > { %p1152_p7 = scmp.ne.s32.totalorder %s1380_s29, %s1151_s27  ;;  %s1156_s13 = sshll.u32 %s1231_s28, 4  ;;  %s1157_s13 = int_to_ptr.vmem [resolvable:$false] %s1156_s13 }
  0x7a   : > { %s1158_s12 = scalar_lea.vmem %s1157_s13, 4096  ;;  %p1159_p3 = scmp.lt.s32.totalorder %s1380_s29, %s1157_s13 }
  0x7b   : > { %p1154_p6 = pnand %p1152_p7, %p1589_p2  ;;  %p1160_p9 = scmp.lt.s32.totalorder %s1158_s12, %s1151_s27 }
  0x7d   : > { %p1155_p13 = pneg %p1154_p6  ;;  %p1161_p12 = por %p1160_p9, %p1159_p3 }
  0x7f   : > { %p1162_p10 = pnand %p1161_p12, %p1155_p13 }
  0x81   : > { %1165 = shalt.err (!%p1162_p10)
}
  0x82   : > { %s1232_s8 = smov 1024   ;;  %s1233_s2 = smov 512  }
  0x83   : > { %s1234_s30 = smov 32   ;;  %p1591_p2 = scmp.ne.s32.totalorder %s1586_s16, 0 }
  0x84   : > { %978 = dma.hbm_to_vmem [thread:$0]  (!%p1590_p8), %s1376_s11, 2048, %s1380_s29, %s1342_s18, %s1232_s8, %s1233_s2, %s1234_s30  }
  0x85   : > { %317 = sbr.rel (%p1591_p2) target bundleno = 903 (0x387), region = 44  ;;  %s319_s20 = sand.u32 (!%p1591_p2), 1, %s1208_s22  }
  0x86   : > { %s902_s17 = sshll.u32 (!%p1591_p2), %s319_s20, 3  ;;  %s320_s19 = scalar_lea.sflag (!%p1591_p2), [#allocation4], %s319_s20 }
  0x87   : > { %s1485_s25 = scalar_lea.vmem (!%p1591_p2), [#allocation3], %s902_s17  ;;  %p1592_p11 = scmp.ne.s32.totalorder (!%p1591_p2), %s1585_s14, 0 }
  0x8c   : > { %1191 = dma.done.wait (%p1592_p11), %s320_s19, 128  }
  0x8d   : > { %1193 = vsyncadd (%p1592_p11), %s320_s19, 4294967168  ;;  %s1593_s5 = sadd.s32 4294967295, %s1224_s26   ;;  %s1493_s11 = scalar_lea.vmem [#allocation5], %s902_s17 }
  0x8e   : > { %s328_s9 = sand.u32 1, %s1593_s5  }
  0x8f   : > { %s329_s18 = scalar_lea.sflag [#allocation6], %s328_s9 }
  0x90   : > { %1195 = dma.done.wait (%p1592_p11), %s329_s18, 2176  }
  0x91   : > { %1197 = vsyncadd (%p1592_p11), %s329_s18, 4294965120  ;;  %s904_s29 = sshll.u32 %s319_s20, 7  ;;  %p1594_p8 = scmp.ne.s32.totalorder %s1584_s7, 0 }
  0x92   : > { %s1499_s16 = scalar_lea.vmem [#allocation7], %s904_s29 }
  0x93   : > { %1199 = dma.done.wait (%p1594_p8), [#allocation9], 512  }
  0x94   : > { %1201 = vsyncadd (%p1594_p8), [#allocation9], 4294966784  ;;  %p906_p5 = scmp.ne.s32.totalorder %s1216_s24, 0 }
  0x95   : > { %vm402_vm0 = vcmask (!%p906_p5), 254976   ;;  %v1235_v0 = vmov (!%p906_p5), 0.0  }
  0x96   : > { %401 = sbr.rel (%p906_p5) target bundleno = 157 (0x9d), region = 64  ;;  %403 = vst.msk [vmem:[#allocation2] sm:$0x3] (!%p906_p5), %vm402_vm0, %v1235_v0 }
  0x9d PF: > { %v406_v1 = vld [vmem:[%s1554_s0] sm:$0x3]  ;;  %v475_v2 = vld [vmem:[%s1499_s16 + $0x8] sm:$0xff]  ;;  %v1236_v4 = vmov 0   ;;  %v474_v8 = vld [vmem:[%s1499_s16] sm:$0xff]  ;;  %v417_v30 = vlaneseq  ;;  %vm632_vm1 = vcmask 254976  }
  0x9e   : > { %v479_v3 = vld [vmem:[%s1499_s16 + $0x28] sm:$0xff]  ;;  %1043 = vset.pattern.permute.xlu0 %v1236_v4  ;;  %v477_v6 = vld [vmem:[%s1499_s16 + $0x18] sm:$0xff]  ;;  %v438_v9 = vsub.f32 1.0, %v406_v1  ;;  %v478_v11 = vld [vmem:[%s1499_s16 + $0x20] sm:$0xff]  ;;  %v1237_v28 = vmov 1983009808  }
  0x9f   : > { %v933_v5 = vpack.c.bf16 %v479_v3, %v475_v2  ;;  %v481_v7 = vld [vmem:[%s1499_s16 + $0x38] sm:$0xff]  ;;  %409 = vperm.xlu0 %1043, %v406_v1   ;;  %v476_v12 = vld [vmem:[%s1499_s16 + $0x10] sm:$0xff]  ;;  %v935_v14 = vpack.c.bf16 %v478_v11, %v474_v8  ;;  %v483_v16 = vld [vmem:[%s1499_s16 + $0x48] sm:$0xff]  ;;  %v415_v29 = vunpack.c.l.s4 %v1237_v28  ;;  %v418_v32 = vshrl.u32 %v417_v30, 7  ;;  %p907_p0 = scmp.ne.s32.totalorder %s1216_s24, 1 }
  0xa0   : > { %v941_v10 = vpack.c.bf16 %v481_v7, %v477_v6  ;;  %v480_v13 = vld [vmem:[%s1499_s16 + $0x30] sm:$0xff]  ;;  %v487_v17 = vld [vmem:[%s1499_s16 + $0x68] sm:$0xff]  ;;  %v485_v19 = vld [vmem:[%s1499_s16 + $0x58] sm:$0xff]  ;;  %v1238_v6 = vmov (!%p907_p0), 0.0|0.0   ;;  %vm1239_vm2 = vmmov (!%p907_p0), 0   ;;  %s1595_s10 = sld [smem:[#allocation18_spill]] (!%p907_p0) }
  0xa1   : > { %934 = vmatprep.subr.bf16.mxu0 %v933_v5  ;;  %v943_v15 = vpack.c.bf16 %v480_v13, %v476_v12  ;;  %v937_v18 = vpack.c.bf16 %v487_v17, %v483_v16  ;;  %v489_v20 = vld [vmem:[%s1499_s16 + $0x78] sm:$0xff]  ;;  %v482_v22 = vld [vmem:[%s1499_s16 + $0x40] sm:$0xff]  ;;  %v484_v24 = vld [vmem:[%s1499_s16 + $0x50] sm:$0xff]  ;;  %v416_v31 = vunpack.c.0.s8 %v415_v29  ;;  %v1241_v13 = vmov (!%p907_p0), 0.2   ;;  %s1596_s21 = sld [smem:[#allocation19_spill]] (!%p907_p0) }
  0xa2   : > { %942 = vmatprep.subr.bf16.mxu1 %v941_v10  ;;  %936 = vmatpush1.bf16.xpose.msra.mxu0 %v935_v14  ;;  %v945_v21 = vpack.c.bf16 %v489_v20, %v485_v19  ;;  %v486_v23 = vld [vmem:[%s1499_s16 + $0x60] sm:$0xff]  ;;  %v488_v25 = vld [vmem:[%s1499_s16 + $0x70] sm:$0xff]  ;;  %v490_v61 = vld [vmem:[#allocation2] sm:$0x3]  ;;  %vm653_vm4 = vcmask (!%p907_p0), 261120   ;;  %vm741_vm7 = vcmask (!%p907_p0), 1024  }
  0xa3   : > { %944 = vmatpush1.bf16.xpose.msra.mxu1 %v943_v15  ;;  %441 = vperm.xlu0 %1043, %v438_v9   ;;  %v939_v26 = vpack.c.bf16 %v486_v23, %v482_v22  ;;  %v947_v27 = vpack.c.bf16 %v488_v25, %v484_v24  ;;  %v404_v33 = vld [vmem:[%s1485_s25] sm:$0xff]  ;;  %v405_v34 = vld [vmem:[%s1493_s11] sm:$0xff]  ;;  %v419_v35 = vsub.s32 %v416_v31, %v418_v32  ;;  %v1240_v9 = vmov (!%p907_p0), 0.0  }
  0xa4   : > { %938 = vmatprep.subr.bf16.mxu0 %v937_v18  ;;  %946 = vmatprep.subr.bf16.mxu1 %v945_v21  ;;  %v413_v36 = vcombine.high %v404_v33, %v404_v33  ;;  %v445_v37 = vcombine.high %v405_v34, %v405_v34  ;;  %v649_v3 = vld [vmem:[#allocation8] sm:$0xff] (!%p907_p0)  ;;  %v650_v4 = vld [vmem:[#allocation8 + $0x8] sm:$0xff] (!%p907_p0)  ;;  %v651_v5 = vld [vmem:[#allocation8 + $0x10] sm:$0xff] (!%p907_p0) }
  0xa5   : > { %v420_v38 = vrot.slane %v404_v33, %v419_v35  ;;  %v452_v40 = vrot.slane %v405_v34, %v419_v35  ;;  %v950_v7 = vpack.c.bf16 (!%p907_p0), %v650_v4, %v649_v3  ;;  %v652_v8 = vld [vmem:[#allocation8 + $0x18] sm:$0xff] (!%p907_p0) }
  0xa6   : > { %v427_v39 = vrot.slane %v413_v36, %v419_v35  ;;  %v459_v41 = vrot.slane %v445_v37, %v419_v35  ;;  %v953_v11 = vpack.c.bf16 (!%p907_p0), %v652_v8, %v651_v5  ;;  %v908_v12 = vld [vmem:[%s1595_s10] ss:$0 sm:$0xff] (!%p907_p0) }
  0xa7   : > { %v428_v43 = vcombine.high %v420_v38, %v420_v38  ;;  %v460_v45 = vcombine.high %v452_v40, %v452_v40 }
  0xa8   : > { %v429_v44 = vcombine.high %v427_v39, %v427_v39  ;;  %v461_v46 = vcombine.high %v459_v41, %v459_v41 }
  0xaa   : > { %940 = vmatpush1.bf16.xpose.msra.mxu0 %v939_v26 }
  0xab   : > { %948 = vmatpush1.bf16.xpose.msra.mxu1 %v947_v27  ;;  %949 = vmatprep.subr.bf16.mxu0 (!%p907_p0), %v1238_v6 }
 0x11e   : > { %v410_v42 = vpop.permute.xlu0 %409 }
 0x11f   : > { %v434_v47 = vmul.f32 %v420_v38, %v410_v42  ;;  %v436_v48 = vmul.f32 %v427_v39, %v410_v42  ;;  %v435_v50 = vmul.f32 %v428_v43, %v410_v42  ;;  %v437_v51 = vmul.f32 %v429_v44, %v410_v42 }
 0x122   : > { %v442_v49 = vpop.permute.xlu0 %441 }
 0x123   : > { %v466_v52 = vmul.f32 %v452_v40, %v442_v49  ;;  %v468_v53 = vmul.f32 %v459_v41, %v442_v49  ;;  %v467_v54 = vmul.f32 %v460_v45, %v442_v49  ;;  %v469_v55 = vmul.f32 %v461_v46, %v442_v49 }
 0x125   : > { %v471_v56 = vadd.f32 %v467_v54, %v435_v50  ;;  %v473_v57 = vadd.f32 %v469_v55, %v437_v51  ;;  %v470_v58 = vadd.f32 %v466_v52, %v434_v47  ;;  %v472_v59 = vadd.f32 %v468_v53, %v436_v48 }
 0x127   : > { %555 = vmatprep.mubr.f32.mxu0 %v471_v56  ;;  %625 = vmatprep.mubr.f32.mxu1 %v473_v57 }
 0x128   : > { %556 = vmatmul.mubr.f32.vlgmr.msra.gmra.mrb[0].mxu0 %v470_v58  ;;  %626 = vmatmul.mubr.f32.vlgmr.msra.gmra.mrb[0].mxu1 %v472_v59 }
 0x129   : > { %930 = vmatprep.mubr.msk.f32.mxu0 (!%p907_p0), %vm1239_vm2, %v1240_v9  ;;  %951 = vmatpush3.bf16.msra.mxu0 (!%p907_p0), %v950_v7 }
 0x12a   : > { %952 = vmatprep.subr.bf16.mxu0 (!%p907_p0), %v1238_v6 }
 0x12d   : > { %954 = vmatpush3.bf16.msra.mxu0 (!%p907_p0), %v953_v11 }
 0x1fa   : > { %637 = sbr.rel (%p907_p0) target bundleno = 903 (0x387), region = 68 }
 0x1fb   : > { %v557_v60 = vpop.f32.mrb[0].mxu0  ;;  %v627_v62 = vpop.f32.mrb[0].mxu1 }
 0x1fc   : > { %v628_v63 = vadd.f32 %v627_v62, %v557_v60  ;;  %v559_v0 = vpop.f32.mrb[1].mxu0  ;;  %v629_v1 = vpop.f32.mrb[1].mxu1 }
 0x1fe   : > { %v631_v2 = vadd.f32 %v628_v63, %v490_v61 }
 0x200   : > { %633 = vst.msk [vmem:[#allocation2] sm:$0x3] %vm632_vm1, %v631_v2 }
 0x207   : > { %v638_v10 = vld [vmem:[#allocation2] sm:$0x3] }
 0x208   : > { %vm640_vm3 = vcmp.gt.f32.partialorder %v638_v10, 0.0 }
 0x209   : > { %v641_v14 = vsel %vm640_vm3, 1.0, %v1241_v13 }
 0x20a   : > { %v648_v15 = vmul.f32 %v908_v12, %v641_v14 }
 0x20c   : > { %931 = vmatmul.mubr.msk.f32.vlgmr.msra.gmra.mrb[0].mxu0 %vm653_vm4, %v648_v15 }
 0x2df   : > { %v723_v16 = vpop.f32.mrb[0].mxu0 }
 0x2e0   : > { %v932_v17 = vpop.f32.mrb[1].mxu0  ;;  %v727_v18 = vmul.f32 %v723_v16, %v648_v15 }
 0x2e2   : > { %v728_v19 = vsel %vm632_vm1, %v727_v18, 0.0 }
 0x2e3   : > { %729 = vadd.xlane.f32.xlu0 %v728_v19 }
 0x370   : > { %v730_v20 = vpop.xlane.xlu0 %729 }
 0x371   : > { %v731_v21 = vmax.f32 %v730_v20, 0.0 }
 0x373   : > { %1046 = vrsqrt.f32 %v731_v21  ;;  %vm734_vm5 = vcmp.eq.f32.partialorder %v731_v21, inf  ;;  %v737_v24 = vand.u32 2147483648, %v731_v21  ;;  %vm736_vm6 = vcmp.eq.f32.partialorder %v731_v21, 0.0 }
 0x37d   : > { %v1047_v22 = vpop.eup %1046 }
 0x37e   : > { %v733_v23 = vmul.f32 %v1047_v22, %v731_v21 }
 0x380   : > { %v735_v25 = vsel %vm734_vm5, %v731_v21, %v733_v23 }
 0x381   : > { %v738_v26 = vsel %vm736_vm6, %v737_v24, %v735_v25 }
 0x382   : > { %v910_v27 = vadd.f32 -1.0, %v738_v26 }
 0x384   : > { %v740_v28 = vmul.f32 %v910_v27, %v910_v27 }
 0x386   : > { %742 = vst.msk [vmem:[%s1596_s21] sm:$0x3] %vm741_vm7, %v740_v28 }
 0x387 PF: > { %s23_s26 = sadd.s32 1, %s1224_s26   ;;  %s1597_s27 = sld [smem:[#allocation13_spill]] }
 0x388   : > { %p20_p1 = scmp.ge.s32.totalorder %s23_s26, 4   ;;  %s1598_s23 = sld [smem:[#allocation16_spill]] }
 0x389   : > { %s1599_s24 = sld [smem:[#allocation14_spill]]  ;;  %s1600_s25 = sld [smem:[#allocation15_spill]] }
 0x38a   : > { %s1601_s21 = smov %s1208_s22  ;;  %22 = sbr.rel (!%p20_p1) target bundleno = 11 (0xb), region = 123 }
 0x38d   : > { %s1602_s22 = smov %s1597_s27 }
 0x391   :  { %762 = vsyncpa [#allocation4], 1 }
 0x392   :  { %764 = vsyncpa [#allocation4 + $0x1], 1 }
 0x393   :  { %765 = vsyncpa [#allocation6], 1 }
 0x394   :  { %767 = vsyncpa [#allocation6 + $0x1], 1 }
 0x395   :  { %768 = vsyncpa [#allocation9], 1 }

</bundles_post_ra>
